<compile_context>
chip_gen: v7x
topology: tpu7x:2x2x1
jax: 0.10.0
libtpu: 0.0.40
codegen_flags: <defaults>
</compile_context>

<pallas_src>
import jax
import jax.numpy as jnp
from jax.experimental import pallas as pl
from jax.experimental.pallas import tpu as pltpu


def _round_up(x, m):
    return (x + m - 1) // m * m


def _round_down_min(x, m):
    return max(m, (x // m) * m)


def _tpu_vmem_capacity_bytes():
    try:
        return int(pltpu.get_tpu_info().vmem_capacity_bytes)
    except Exception:
        return 128 * 1024 * 1024


def _device_kind():
    try:
        return jax.devices()[0].device_kind.lower()
    except Exception:
        return ""


def _linear_classifier_kernel(cls_ref, patch_ref, wcls_ref, wavg_ref, b_ref,
                              o_ref, sum_ref):
    # Grid: (batch tile index, token tile index).  Token axis = reduction (last).
    # cls_ref:   [tB, n*D]      concatenated class tokens (token dtype)
    # patch_ref: [tB, tT, D]    one streamed token tile of last-block patch tokens
    # wcls_ref:  [n*D, Cpad]    weight slice for class-token features (resident)
    # wavg_ref:  [D,   Cpad]    f32 weight slice for avg-pool feats, pre-scaled 1/T
    # b_ref:     [1,   Cpad]    bias (f32, resident)
    # o_ref:     [tB,  Cpad]    logits (f32), written once per batch tile
    # sum_ref:   [tB,  D]       f32 running token-sum accumulator (VMEM scratch)
    t = pl.program_id(1)

    # f32-accumulating reduction of this tile (no full f32 tile materialization).
    partial = jnp.sum(patch_ref[...], axis=1, dtype=jnp.float32)

    @pl.when(t == 0)
    def _():
        sum_ref[...] = partial                      # init fused with first accum

    @pl.when(t > 0)
    def _():
        sum_ref[...] = sum_ref[...] + partial

    @pl.when(t == pl.num_programs(1) - 1)
    def _():
        # Class-token features: [tB, n*D] @ [n*D, Cpad] with f32 accumulation.
        acc = jnp.dot(cls_ref[...], wcls_ref[...],
                      preferred_element_type=jnp.float32)
        # Avg-pool features: 1/T is folded into f32 wavg; sum stays f32 end-to-end.
        acc = acc + jnp.dot(sum_ref[...], wavg_ref[...],
                            preferred_element_type=jnp.float32)
        o_ref[...] = (acc + b_ref[...]).astype(o_ref.dtype)


def prepare_linear_params(weight, bias, kcls, num_patch_tokens, compute_dtype):
    """One-time parameter reshuffle — hoist/cache this across eval batches."""
    num_classes = weight.shape[0]
    cpad = _round_up(num_classes, 128)              # lane-dense output stores
    pad = cpad - num_classes
    w_t = weight.T                                  # [out_dim, C]
    w_cls = w_t[:kcls].astype(compute_dtype)        # [Kcls, C]
    # Keep the avg-pool slice in f32 and fold the 1/T mean scale there so the
    # f32 streamed token sum never loses precision to a low-precision downcast.
    w_avg = w_t[kcls:].astype(jnp.float32) * jnp.float32(1.0 / num_patch_tokens)
    if pad:
        w_cls = jnp.pad(w_cls, ((0, 0), (0, pad)))
        w_avg = jnp.pad(w_avg, ((0, 0), (0, pad)))
    b2d = jnp.pad(bias.astype(jnp.float32), (0, pad)).reshape(1, cpad)
    return w_cls, w_avg, b2d, cpad


def linear_classifier_forward(x_tokens_list, weight, bias, use_n_blocks,
                              use_avgpool, class_token=True, prepared=None):
    """Pallas implementation of LinearClassifier.forward (class_token=True path)."""
    assert class_token and use_avgpool, (
        "only the class_token=True, use_avgpool=True branch is implemented")
    # TODO(synk): class_token=False / use_avgpool=False branches not implemented.

    intermediate = x_tokens_list[-use_n_blocks:]
    patch_last = intermediate[-1][0]                      # [B, T, D]
    B, T, D = patch_last.shape
    num_classes = weight.shape[0]
    compute_dtype = patch_last.dtype
    itemsize = jnp.dtype(compute_dtype).itemsize

    # Glue (zero flops): gather class token 0 of each block, concat along features.
    cls_feat = jnp.concatenate(
        [ct[:, 0].astype(compute_dtype) for _, ct in intermediate], axis=-1
    )                                                     # [B, n*D]
    Kcls = cls_feat.shape[-1]

    if prepared is None:
        prepared = prepare_linear_params(weight, bias, Kcls, T, compute_dtype)
    w_cls, w_avg, b2d, Cpad = prepared

    # ---- Generation-aware tile selection ----------------------------------
    vmem_cap = _tpu_vmem_capacity_bytes()
    kind = _device_kind()
    small_vmem = vmem_cap <= 96 * 1024 * 1024             # v7x: 64 MiB per TC
    num_tc = 2 if any(s in kind for s in ("v7", "v5p", "v4")) else 1
    is_v5e = any(s in kind for s in ("v5e", "v5 lite", "v5lite"))

    # Batch tile: fill the 256-wide MXU on v6e/v7x when the batch allows,
    # keep 128 on v5e (128x128 MXU); always a multiple of 8 and <= padded batch.
    tB = 256 if (B >= 256 and not is_v5e) else 128
    tB = min(tB, _round_up(B, 8))
    # Keep at least num_tc batch tiles so "parallel" actually shards across cores.
    while num_tc > 1 and tB > 8 and (_round_up(B, tB) // tB) < num_tc:
        tB = max(8, _round_up(tB // 2, 8))

    # Patch-token streaming tile: budget *total* buffered bytes; deeper buffering
    # on v7x where HBM is fast enough that per-step overheads become visible.
    patch_buffers = 3 if small_vmem else 2
    patch_budget = (10 if small_vmem else 48) * 1024 * 1024
    tT_cap = patch_budget // max(patch_buffers * tB * D * itemsize, 1)
    tT_cap = _round_down_min(min(tT_cap, 1024), 8)        # round DOWN against cap
    tT = min(_round_up(T, 8), tT_cap)

    B_pad = _round_up(B, tB)
    T_pad = _round_up(T, tT)
    if B_pad != B or T_pad != T:
        # Zero token rows contribute 0 to the sum; padded batch rows sliced off.
        patch_last = jnp.pad(patch_last,
                             ((0, B_pad - B), (0, T_pad - T), (0, 0)))
    if B_pad != B:
        cls_feat = jnp.pad(cls_feat, ((0, B_pad - B), (0, 0)))

    grid = (B_pad // tB, T_pad // tT)

    # ---- VMEM budget (clamped to physical capacity) ------------------------
    w_bytes = (int(w_cls.size) * itemsize + int(w_avg.size) * 4
               + int(b2d.size) * 4)
    tile_bytes = (patch_buffers * tB * tT * D * itemsize   # streamed patch tiles
                  + 2 * tB * Kcls * itemsize               # class-token tile
                  + 2 * tB * Cpad * 4                      # output tile
                  + tB * D * 4                             # f32 sum scratch
                  + w_bytes)                               # single-buffered weights
    vmem_limit = int(tile_bytes * 1.4) + (2 << 20)
    vmem_limit = max(16 * 1024 * 1024, vmem_limit)
    vmem_limit = min(vmem_limit, vmem_cap - 4 * 1024 * 1024)

    cost = pl.CostEstimate(
        flops=2 * B_pad * (Kcls + D) * Cpad + B_pad * T_pad * D,
        transcendentals=0,
        bytes_accessed=(B_pad * T_pad * D + B_pad * Kcls) * itemsize
                       + w_bytes + B_pad * Cpad * 4,
    )

    # TODO(synk): very large heads (weights (Kcls+D)*Cpad >> VMEM, e.g. IN-22k)
    # need a class-tiled grid axis or a two-pass feature/matmul split; the
    # resident-weight layout below covers DINOv2 eval heads up to a few K classes.

    def _call(use_pipeline_modes):
        def spec(shape, index_map, buffers):
            if use_pipeline_modes and buffers is not None:
                return pl.BlockSpec(shape, index_map,
                                    pipeline_mode=pl.Buffered(buffers))
            return pl.BlockSpec(shape, index_map)

        return pl.pallas_call(
            _linear_classifier_kernel,
            out_shape=jax.ShapeDtypeStruct((B_pad, Cpad), jnp.float32),
            grid_spec=pltpu.PrefetchScalarGridSpec(
                num_scalar_prefetch=0,
                grid=grid,
                in_specs=[
                    spec((tB, Kcls), lambda b, t: (b, 0), None),        # cls feat
                    spec((tB, tT, D), lambda b, t: (b, t, 0),
                         patch_buffers),                                # patch stream
                    spec((Kcls, Cpad), lambda b, t: (0, 0), 1),         # w_cls resident
                    spec((D, Cpad), lambda b, t: (0, 0), 1),            # w_avg resident
                    spec((1, Cpad), lambda b, t: (0, 0), 1),            # bias resident
                ],
                out_specs=pl.BlockSpec((tB, Cpad), lambda b, t: (b, 0)),
                scratch_shapes=[pltpu.VMEM((tB, D), jnp.float32)],
            ),
            compiler_params=pltpu.CompilerParams(
                dimension_semantics=("parallel", "arbitrary"),
                vmem_limit_bytes=vmem_limit,
            ),
            cost_estimate=cost,
        )(cls_feat, patch_last, w_cls, w_avg, b2d)

    try:
        out = _call(True)
    except Exception:
        # Robust fallback if this JAX build rejects pipeline_mode=pl.Buffered(n).
        out = _call(False)

    if B_pad == B and Cpad == num_classes:
        return out
    return out[:B, :num_classes]


if __name__ == "__main__":
    # Small, deterministic configuration.
    B, T, D = 2, 8, 32          # batch, patch tokens per block, embed dim
    use_n_blocks = 2
    use_avgpool = True
    num_classes = 16
    out_dim = use_n_blocks * D + D  # 96, matches LinearClassifier(out_dim=...)

    key = jax.random.PRNGKey(0)
    keys = jax.random.split(key, 2 * use_n_blocks + 2)

    # Build x_tokens_list: list of (patch_tokens [B,T,D], class_tokens [B,1+T,D])
    x_tokens_list = []
    for i in range(use_n_blocks):
        patch = jax.random.normal(keys[2 * i], (B, T, D), dtype=jnp.float32)
        clstk = jax.random.normal(keys[2 * i + 1], (B, 1 + T, D), dtype=jnp.float32)
        x_tokens_list.append((patch, clstk))

    # nn.Linear(out_dim, num_classes): weight ~ N(0, 0.01), bias = 0.
    weight = 0.01 * jax.random.normal(keys[-2], (num_classes, out_dim),
                                      dtype=jnp.float32)
    bias = jnp.zeros((num_classes,), dtype=jnp.float32)

    logits = linear_classifier_forward(
        x_tokens_list, weight, bias, use_n_blocks, use_avgpool, class_token=True
    )
    logits = jax.block_until_ready(logits)

    # Pure-JAX reference (mirrors the PyTorch forward exactly).
    inter = x_tokens_list[-use_n_blocks:]
    feat = jnp.concatenate([ct[:, 0] for _, ct in inter], axis=-1)
    feat = jnp.concatenate([feat, jnp.mean(inter[-1][0], axis=1)], axis=-1)
    ref = feat.astype(jnp.float32) @ weight.T + bias

    assert logits.shape == (B, num_classes)
    assert jnp.allclose(logits, ref, atol=1e-4, rtol=1e-4)
    print("KERNEL_OK")
</pallas_src>

<mosaic_0001>
module attributes {stable_mosaic.version = 11 : i64} {
  func.func @_linear_classifier_kernel(%arg0: i32, %arg1: i32, %arg2: memref<8x64xf32, #tpu.memory_space<vmem>>, %arg3: memref<8x8x32xf32, #tpu.memory_space<vmem>>, %arg4: memref<64x128xf32, #tpu.memory_space<vmem>>, %arg5: memref<32x128xf32, #tpu.memory_space<vmem>>, %arg6: memref<1x128xf32, #tpu.memory_space<vmem>>, %arg7: memref<8x128xf32, #tpu.memory_space<vmem>>, %arg8: memref<8x32xf32, #tpu.memory_space<vmem>>) attributes {dimension_semantics = [#tpu.dimension_semantics<parallel>, #tpu.dimension_semantics<arbitrary>], iteration_bounds = array<i64: 1, 1>, scalar_prefetch = 0 : i64, scratch_operands = 1 : i64, tpu.core_type = #tpu.core_type<tc>, window_params = [{transform_indices = @transform_0, window_bounds = array<i64: 8, 64>}, {pipeline_mode = #tpu.pipeline_mode<double_buffered>, transform_indices = @transform_1, window_bounds = array<i64: 8, 8, 32>}, {pipeline_mode = #tpu.pipeline_mode<synchronous>, transform_indices = @transform_2, window_bounds = array<i64: 64, 128>}, {pipeline_mode = #tpu.pipeline_mode<synchronous>, transform_indices = @transform_3, window_bounds = array<i64: 32, 128>}, {pipeline_mode = #tpu.pipeline_mode<synchronous>, transform_indices = @transform_4, window_bounds = array<i64: 1, 128>}, {transform_indices = @transform_5, window_bounds = array<i64: 8, 128>}]} {
    %c0 = arith.constant 0 : index
    %c0_0 = arith.constant 0 : index
    %c0_1 = arith.constant 0 : index
    %0 = vector.load %arg3[%c0, %c0_0, %c0_1] : memref<8x8x32xf32, #tpu.memory_space<vmem>>, vector<8x8x32xf32>
    %cst = arith.constant dense<0.000000e+00> : vector<8x32xf32>
    %1 = vector.multi_reduction <add>, %0, %cst [1] : vector<8x8x32xf32> to vector<8x32xf32>
    %c0_i32 = arith.constant 0 : i32
    %2 = arith.cmpi eq, %arg1, %c0_i32 : i32
    %3 = arith.extui %2 : i1 to i32
    %c0_i32_2 = arith.constant 0 : i32
    %4 = arith.cmpi ne, %3, %c0_i32_2 : i32
    scf.if %4 {
      %c0_7 = arith.constant 0 : index
      %c0_8 = arith.constant 0 : index
      %11 = vector.load %arg8[%c0_7, %c0_8] : memref<8x32xf32, #tpu.memory_space<vmem>>, vector<8x32xf32>
      tpu.vector_store %arg8[%c0_7, %c0_8], %1 {strides = array<i32>} : memref<8x32xf32, #tpu.memory_space<vmem>>, vector<8x32xf32>,
    } else {
    }
    %c0_i32_3 = arith.constant 0 : i32
    %5 = arith.cmpi sgt, %arg1, %c0_i32_3 : i32
    %6 = arith.extui %5 : i1 to i32
    %c0_i32_4 = arith.constant 0 : i32
    %7 = arith.cmpi ne, %6, %c0_i32_4 : i32
    scf.if %7 {
      %c0_7 = arith.constant 0 : index
      %c0_8 = arith.constant 0 : index
      %11 = vector.load %arg8[%c0_7, %c0_8] : memref<8x32xf32, #tpu.memory_space<vmem>>, vector<8x32xf32>
      %12 = arith.addf %11, %1 : vector<8x32xf32>
      %c0_9 = arith.constant 0 : index
      %c0_10 = arith.constant 0 : index
      %13 = vector.load %arg8[%c0_9, %c0_10] : memref<8x32xf32, #tpu.memory_space<vmem>>, vector<8x32xf32>
      tpu.vector_store %arg8[%c0_9, %c0_10], %12 {strides = array<i32>} : memref<8x32xf32, #tpu.memory_space<vmem>>, vector<8x32xf32>,
    } else {
    }
    %c0_i32_5 = arith.constant 0 : i32
    %8 = arith.cmpi eq, %arg1, %c0_i32_5 : i32
    %9 = arith.extui %8 : i1 to i32
    %c0_i32_6 = arith.constant 0 : i32
    %10 = arith.cmpi ne, %9, %c0_i32_6 : i32
    scf.if %10 {
      %c0_7 = arith.constant 0 : index
      %c0_8 = arith.constant 0 : index
      %11 = vector.load %arg2[%c0_7, %c0_8] : memref<8x64xf32, #tpu.memory_space<vmem>>, vector<8x64xf32>
      %c0_9 = arith.constant 0 : index
      %c0_10 = arith.constant 0 : index
      %12 = vector.load %arg4[%c0_9, %c0_10] : memref<64x128xf32, #tpu.memory_space<vmem>>, vector<64x128xf32>
      %cst_11 = arith.constant dense<0.000000e+00> : vector<8x128xf32>
      %13 = tpu.matmul %11, %12, %cst_11 {dimension_numbers = #tpu.dot_dimension_numbers<[1], [0], [0], [1], [0, 0, 1, 1], [], []>} : vector<8x64xf32>, vector<64x128xf32>, vector<8x128xf32> -> vector<8x128xf32>
      %c0_12 = arith.constant 0 : index
      %c0_13 = arith.constant 0 : index
      %14 = vector.load %arg8[%c0_12, %c0_13] : memref<8x32xf32, #tpu.memory_space<vmem>>, vector<8x32xf32>
      %c0_14 = arith.constant 0 : index
      %c0_15 = arith.constant 0 : index
      %15 = vector.load %arg5[%c0_14, %c0_15] : memref<32x128xf32, #tpu.memory_space<vmem>>, vector<32x128xf32>
      %cst_16 = arith.constant dense<0.000000e+00> : vector<8x128xf32>
      %16 = tpu.matmul %14, %15, %cst_16 {dimension_numbers = #tpu.dot_dimension_numbers<[1], [0], [0], [1], [0, 0, 1, 1], [], []>} : vector<8x32xf32>, vector<32x128xf32>, vector<8x128xf32> -> vector<8x128xf32>
      %17 = arith.addf %13, %16 : vector<8x128xf32>
      %c0_17 = arith.constant 0 : index
      %c0_18 = arith.constant 0 : index
      %18 = vector.load %arg6[%c0_17, %c0_18] : memref<1x128xf32, #tpu.memory_space<vmem>>, vector<1x128xf32>
      %19 = vector.broadcast %18 : vector<1x128xf32> to vector<8x128xf32>
      %20 = arith.addf %17, %19 : vector<8x128xf32>
      %c0_19 = arith.constant 0 : index
      %c0_20 = arith.constant 0 : index
      %21 = vector.load %arg7[%c0_19, %c0_20] : memref<8x128xf32, #tpu.memory_space<vmem>>, vector<8x128xf32>
      tpu.vector_store %arg7[%c0_19, %c0_20], %20 {strides = array<i32>} : memref<8x128xf32, #tpu.memory_space<vmem>>, vector<8x128xf32>,
    } else {
    }
    return
  }
  func.func @transform_0(%arg0: i32, %arg1: i32) -> (i32, i32) {
    %c0_i32 = arith.constant 0 : i32
    %c0_i32_0 = arith.constant 0 : i32
    return %arg0, %c0_i32 : i32, i32
  }
  func.func @transform_1(%arg0: i32, %arg1: i32) -> (i32, i32, i32) {
    %c0_i32 = arith.constant 0 : i32
    %c0_i32_0 = arith.constant 0 : i32
    return %arg0, %arg1, %c0_i32 : i32, i32, i32
  }
  func.func @transform_2(%arg0: i32, %arg1: i32) -> (i32, i32) {
    %c0_i32 = arith.constant 0 : i32
    %c0_i32_0 = arith.constant 0 : i32
    %c0_i32_1 = arith.constant 0 : i32
    return %c0_i32, %c0_i32_0 : i32, i32
  }
  func.func @transform_3(%arg0: i32, %arg1: i32) -> (i32, i32) {
    %c0_i32 = arith.constant 0 : i32
    %c0_i32_0 = arith.constant 0 : i32
    %c0_i32_1 = arith.constant 0 : i32
    return %c0_i32, %c0_i32_0 : i32, i32
  }
  func.func @transform_4(%arg0: i32, %arg1: i32) -> (i32, i32) {
    %c0_i32 = arith.constant 0 : i32
    %c0_i32_0 = arith.constant 0 : i32
    %c0_i32_1 = arith.constant 0 : i32
    return %c0_i32, %c0_i32_0 : i32, i32
  }
  func.func @transform_5(%arg0: i32, %arg1: i32) -> (i32, i32) {
    %c0_i32 = arith.constant 0 : i32
    %c0_i32_0 = arith.constant 0 : i32
    return %arg0, %c0_i32 : i32, i32
  }
}

module attributes {stable_mosaic.version = 11 : i64} {
  func.func @_linear_classifier_kernel(%arg0: i32, %arg1: i32, %arg2: memref<8x64xf32, #tpu.memory_space<vmem>>, %arg3: memref<8x8x32xf32, #tpu.memory_space<vmem>>, %arg4: memref<64x128xf32, #tpu.memory_space<vmem>>, %arg5: memref<32x128xf32, #tpu.memory_space<vmem>>, %arg6: memref<1x128xf32, #tpu.memory_space<vmem>>, %arg7: memref<8x128xf32, #tpu.memory_space<vmem>>, %arg8: memref<8x32xf32, #tpu.memory_space<vmem>>) attributes {dimension_semantics = [#tpu.dimension_semantics<parallel>, #tpu.dimension_semantics<arbitrary>], iteration_bounds = array<i64: 1, 1>, scalar_prefetch = 0 : i64, scratch_operands = 1 : i64, tpu.core_type = #tpu.core_type<tc>, window_params = [{transform_indices = @transform_0, window_bounds = array<i64: 8, 64>}, {transform_indices = @transform_1, window_bounds = array<i64: 8, 8, 32>}, {pipeline_mode = #tpu.pipeline_mode<synchronous>, transform_indices = @transform_2, window_bounds = array<i64: 64, 128>}, {pipeline_mode = #tpu.pipeline_mode<synchronous>, transform_indices = @transform_3, window_bounds = array<i64: 32, 128>}, {pipeline_mode = #tpu.pipeline_mode<synchronous>, transform_indices = @transform_4, window_bounds = array<i64: 1, 128>}, {transform_indices = @transform_5, window_bounds = array<i64: 8, 128>}]} {
    %c0 = arith.constant 0 : index
    %c0_0 = arith.constant 0 : index
    %c0_1 = arith.constant 0 : index
    %0 = vector.load %arg3[%c0, %c0_0, %c0_1] : memref<8x8x32xf32, #tpu.memory_space<vmem>>, vector<8x8x32xf32>
    %cst = arith.constant dense<0.000000e+00> : vector<8x32xf32>
    %1 = vector.multi_reduction <add>, %0, %cst [1] : vector<8x8x32xf32> to vector<8x32xf32>
    %c0_i32 = arith.constant 0 : i32
    %2 = arith.cmpi eq, %arg1, %c0_i32 : i32
    %3 = arith.extui %2 : i1 to i32
    %c0_i32_2 = arith.constant 0 : i32
    %4 = arith.cmpi ne, %3, %c0_i32_2 : i32
    scf.if %4 {
      %c0_7 = arith.constant 0 : index
      %c0_8 = arith.constant 0 : index
      %11 = vector.load %arg8[%c0_7, %c0_8] : memref<8x32xf32, #tpu.memory_space<vmem>>, vector<8x32xf32>
      tpu.vector_store %arg8[%c0_7, %c0_8], %1 {strides = array<i32>} : memref<8x32xf32, #tpu.memory_space<vmem>>, vector<8x32xf32>,
    } else {
    }
    %c0_i32_3 = arith.constant 0 : i32
    %5 = arith.cmpi sgt, %arg1, %c0_i32_3 : i32
    %6 = arith.extui %5 : i1 to i32
    %c0_i32_4 = arith.constant 0 : i32
    %7 = arith.cmpi ne, %6, %c0_i32_4 : i32
    scf.if %7 {
      %c0_7 = arith.constant 0 : index
      %c0_8 = arith.constant 0 : index
      %11 = vector.load %arg8[%c0_7, %c0_8] : memref<8x32xf32, #tpu.memory_space<vmem>>, vector<8x32xf32>
      %12 = arith.addf %11, %1 : vector<8x32xf32>
      %c0_9 = arith.constant 0 : index
      %c0_10 = arith.constant 0 : index
      %13 = vector.load %arg8[%c0_9, %c0_10] : memref<8x32xf32, #tpu.memory_space<vmem>>, vector<8x32xf32>
      tpu.vector_store %arg8[%c0_9, %c0_10], %12 {strides = array<i32>} : memref<8x32xf32, #tpu.memory_space<vmem>>, vector<8x32xf32>,
    } else {
    }
    %c0_i32_5 = arith.constant 0 : i32
    %8 = arith.cmpi eq, %arg1, %c0_i32_5 : i32
    %9 = arith.extui %8 : i1 to i32
    %c0_i32_6 = arith.constant 0 : i32
    %10 = arith.cmpi ne, %9, %c0_i32_6 : i32
    scf.if %10 {
      %c0_7 = arith.constant 0 : index
      %c0_8 = arith.constant 0 : index
      %11 = vector.load %arg2[%c0_7, %c0_8] : memref<8x64xf32, #tpu.memory_space<vmem>>, vector<8x64xf32>
      %c0_9 = arith.constant 0 : index
      %c0_10 = arith.constant 0 : index
      %12 = vector.load %arg4[%c0_9, %c0_10] : memref<64x128xf32, #tpu.memory_space<vmem>>, vector<64x128xf32>
      %cst_11 = arith.constant dense<0.000000e+00> : vector<8x128xf32>
      %13 = tpu.matmul %11, %12, %cst_11 {dimension_numbers = #tpu.dot_dimension_numbers<[1], [0], [0], [1], [0, 0, 1, 1], [], []>} : vector<8x64xf32>, vector<64x128xf32>, vector<8x128xf32> -> vector<8x128xf32>
      %c0_12 = arith.constant 0 : index
      %c0_13 = arith.constant 0 : index
      %14 = vector.load %arg8[%c0_12, %c0_13] : memref<8x32xf32, #tpu.memory_space<vmem>>, vector<8x32xf32>
      %c0_14 = arith.constant 0 : index
      %c0_15 = arith.constant 0 : index
      %15 = vector.load %arg5[%c0_14, %c0_15] : memref<32x128xf32, #tpu.memory_space<vmem>>, vector<32x128xf32>
      %cst_16 = arith.constant dense<0.000000e+00> : vector<8x128xf32>
      %16 = tpu.matmul %14, %15, %cst_16 {dimension_numbers = #tpu.dot_dimension_numbers<[1], [0], [0], [1], [0, 0, 1, 1], [], []>} : vector<8x32xf32>, vector<32x128xf32>, vector<8x128xf32> -> vector<8x128xf32>
      %17 = arith.addf %13, %16 : vector<8x128xf32>
      %c0_17 = arith.constant 0 : index
      %c0_18 = arith.constant 0 : index
      %18 = vector.load %arg6[%c0_17, %c0_18] : memref<1x128xf32, #tpu.memory_space<vmem>>, vector<1x128xf32>
      %19 = vector.broadcast %18 : vector<1x128xf32> to vector<8x128xf32>
      %20 = arith.addf %17, %19 : vector<8x128xf32>
      %c0_19 = arith.constant 0 : index
      %c0_20 = arith.constant 0 : index
      %21 = vector.load %arg7[%c0_19, %c0_20] : memref<8x128xf32, #tpu.memory_space<vmem>>, vector<8x128xf32>
      tpu.vector_store %arg7[%c0_19, %c0_20], %20 {strides = array<i32>} : memref<8x128xf32, #tpu.memory_space<vmem>>, vector<8x128xf32>,
    } else {
    }
    return
  }
  func.func @transform_0(%arg0: i32, %arg1: i32) -> (i32, i32) {
    %c0_i32 = arith.constant 0 : i32
    %c0_i32_0 = arith.constant 0 : i32
    return %arg0, %c0_i32 : i32, i32
  }
  func.func @transform_1(%arg0: i32, %arg1: i32) -> (i32, i32, i32) {
    %c0_i32 = arith.constant 0 : i32
    %c0_i32_0 = arith.constant 0 : i32
    return %arg0, %arg1, %c0_i32 : i32, i32, i32
  }
  func.func @transform_2(%arg0: i32, %arg1: i32) -> (i32, i32) {
    %c0_i32 = arith.constant 0 : i32
    %c0_i32_0 = arith.constant 0 : i32
    %c0_i32_1 = arith.constant 0 : i32
    return %c0_i32, %c0_i32_0 : i32, i32
  }
  func.func @transform_3(%arg0: i32, %arg1: i32) -> (i32, i32) {
    %c0_i32 = arith.constant 0 : i32
    %c0_i32_0 = arith.constant 0 : i32
    %c0_i32_1 = arith.constant 0 : i32
    return %c0_i32, %c0_i32_0 : i32, i32
  }
  func.func @transform_4(%arg0: i32, %arg1: i32) -> (i32, i32) {
    %c0_i32 = arith.constant 0 : i32
    %c0_i32_0 = arith.constant 0 : i32
    %c0_i32_1 = arith.constant 0 : i32
    return %c0_i32, %c0_i32_0 : i32, i32
  }
  func.func @transform_5(%arg0: i32, %arg1: i32) -> (i32, i32) {
    %c0_i32 = arith.constant 0 : i32
    %c0_i32_0 = arith.constant 0 : i32
    return %arg0, %c0_i32 : i32, i32
  }
}

</mosaic_0001>

<bundles_post_ra>
// kernel: tpu_custom_call.1
= control target key start
LH: loop header
LB: loop body
LE: loop exit
PB: predicated region body
PF: predicated region fallthrough
CT: control target
= control target key end

     0   :  { %10 = vsyncpa [#allocation4], 0  ;;  %s719_s0 = inlined_call_operand.hbm [shape: f32[8,64], index: 0, kind: input, shape index: {}]   ;;  %s720_s1 = inlined_call_operand.hbm [shape: f32[8,8,32], index: 1, kind: input, shape index: {}]   ;;  %s721_s2 = inlined_call_operand.hbm [shape: f32[64,128], index: 2, kind: input, shape index: {}]   ;;  %s722_s3 = inlined_call_operand.hbm [shape: f32[32,128], index: 3, kind: input, shape index: {}]   ;;  %s723_s4 = inlined_call_operand.vmem [shape: f32[1,128], index: 4, kind: input, shape index: {}]   ;;  %s724_s5 = inlined_call_operand.hbm [shape: f32[8,128], index: 5, kind: output, shape index: {}]  }
   0x1   :  { %11 = vsyncpa [#allocation7], 0 }
   0x2   :  { %12 = vsyncpa [#allocation10], 0 }
   0x3   :  { %13 = vsyncpa [#allocation5], 0  ;;  %s580_s18 = smov [#allocation6]   ;;  %s462_s22 = scalar_lea.hbm %s720_s1, 1024 }
   0x4   :  { %s29_s19 = sshll.u32 %s580_s18, 4  ;;  %p463_p0 = scmp.ne.s32.totalorder %s720_s1, %s462_s22  ;;  %s30_s19 = int_to_ptr.vmem [resolvable:$true] %s29_s19 }
   0x5   :  { %p466_p1 = scmp.lt.u32.totalorder %s462_s22, %s720_s1 }
   0x7   :  { %p468_p2 = pnand %p466_p1, %p463_p0 }
   0x9   :  { %471 = shalt.err (!%p468_p2)
}
   0xa   :  { %s472_s27 = scalar_lea.vmem %s30_s19, 1024  ;;  %p477_p4 = scmp.lt.s32.totalorder %s30_s19, %s30_s19 }
   0xb   :  { %p473_p3 = scmp.ne.s32.totalorder %s30_s19, %s472_s27  ;;  %p478_p5 = scmp.lt.s32.totalorder %s472_s27, %s472_s27 }
   0xd   :  { %p479_p6 = por %p478_p5, %p477_p4 }
   0xf   :  { %p480_p7 = pnand %p479_p6, %p473_p3 }
  0x11   :  { %483 = shalt.err (!%p480_p7)
}
  0x12   :  { %s581_s28 = smov 128   ;;  %s582_s29 = smov 8  }
  0x13   :  { %35 = dma.hbm_to_vmem [thread:$0]  %s720_s1, 1024, %s30_s19, [#allocation7], %s581_s28, %s581_s28, %s582_s29  }
  0x14   :  { %s583_s7 = smov [#allocation3]   ;;  %s584_s9 = smov [#allocation8]  }
  0x15   :  { %s20_s8 = sshll.u32 %s583_s7, 4  ;;  %s41_s10 = sshll.u32 %s584_s9, 4  ;;  %s21_s8 = int_to_ptr.vmem [resolvable:$true] %s20_s8  ;;  %s42_s10 = int_to_ptr.vmem [resolvable:$true] %s41_s10 }
  0x16   :  { %s484_s13 = scalar_lea.hbm %s719_s0, 128 }
  0x17   :  { %p485_p8 = scmp.ne.s32.totalorder %s719_s0, %s484_s13  ;;  %p488_p9 = scmp.lt.u32.totalorder %s484_s13, %s719_s0 }
  0x19   :  { %p490_p10 = pnand %p488_p9, %p485_p8 }
  0x1b   :  { %493 = shalt.err (!%p490_p10)
}
  0x1c   :  { %s494_s1 = scalar_lea.vmem %s21_s8, 128  ;;  %p499_p12 = scmp.lt.s32.totalorder %s21_s8, %s21_s8 }
  0x1d   :  { %p495_p11 = scmp.ne.s32.totalorder %s21_s8, %s494_s1  ;;  %p500_p13 = scmp.lt.s32.totalorder %s494_s1, %s494_s1 }
  0x1f   :  { %p501_p0 = por %p500_p13, %p499_p12 }
  0x21   :  { %p502_p1 = pnand %p501_p0, %p495_p11 }
  0x23   :  { %505 = shalt.err (!%p502_p1)
}
  0x24   :  { %23 = dma.hbm_to_vmem [thread:$0]  %s719_s0, 128, %s21_s8, [#allocation4]  }
  0x25   :  { %s506_s22 = scalar_lea.hbm %s721_s2, 1024 }
  0x26   :  { %p507_p2 = scmp.ne.s32.totalorder %s721_s2, %s506_s22  ;;  %p510_p3 = scmp.lt.u32.totalorder %s506_s22, %s721_s2 }
  0x28   :  { %p512_p4 = pnand %p510_p3, %p507_p2 }
  0x2a   :  { %515 = shalt.err (!%p512_p4)
}
  0x2b   :  { %s516_s27 = scalar_lea.vmem %s42_s10, 1024  ;;  %p521_p6 = scmp.lt.s32.totalorder %s42_s10, %s42_s10 }
  0x2c   :  { %p517_p5 = scmp.ne.s32.totalorder %s42_s10, %s516_s27  ;;  %p522_p7 = scmp.lt.s32.totalorder %s516_s27, %s516_s27 }
  0x2e   :  { %p523_p8 = por %p522_p7, %p521_p6 }
  0x30   :  { %p524_p9 = pnand %p523_p8, %p517_p5 }
  0x32   :  { %527 = shalt.err (!%p524_p9)
}
  0x33   :  { %47 = dma.hbm_to_vmem [thread:$0]  %s721_s2, 1024, %s42_s10, [#allocation7], %s581_s28, %s581_s28, %s582_s29  }
  0x34   :  { %s585_s6 = smov [#allocation9]   ;;  %s528_s11 = scalar_lea.hbm %s722_s3, 512 }
  0x35   :  { %s53_s7 = sshll.u32 %s585_s6, 4  ;;  %p529_p10 = scmp.ne.s32.totalorder %s722_s3, %s528_s11  ;;  %s54_s7 = int_to_ptr.vmem [resolvable:$true] %s53_s7 }
  0x36   :  { %p532_p11 = scmp.lt.u32.totalorder %s528_s11, %s722_s3 }
  0x38   :  { %p534_p12 = pnand %p532_p11, %p529_p10 }
  0x3a   :  { %537 = shalt.err (!%p534_p12)
}
  0x3b   :  { %s538_s16 = scalar_lea.vmem %s54_s7, 512  ;;  %p543_p0 = scmp.lt.s32.totalorder %s54_s7, %s54_s7 }
  0x3c   :  { %p539_p13 = scmp.ne.s32.totalorder %s54_s7, %s538_s16  ;;  %p544_p1 = scmp.lt.s32.totalorder %s538_s16, %s538_s16 }
  0x3e   :  { %p545_p2 = por %p544_p1, %p543_p0 }
  0x40   :  { %p546_p3 = pnand %p545_p2, %p539_p13 }
  0x42   :  { %549 = shalt.err (!%p546_p3)
}
  0x43   :  { %59 = dma.hbm_to_vmem [thread:$0]  %s722_s3, 512, %s54_s7, [#allocation10], %s581_s28, %s581_s28, %s582_s29  }
  0x44   :  { %572 = dma.done.wait [#allocation4], 128  }
  0x45   :  { %573 = vsyncadd [#allocation4], 4294967168 }
  0x46   :  { %574 = dma.done.wait [#allocation7], 2048  }
  0x47   :  { %575 = vsyncadd [#allocation7], 4294965248 }
  0x48   :  { %576 = dma.done.wait [#allocation10], 512  }
  0x49   :  { %577 = vsyncadd [#allocation10], 4294966784  ;;  %v586_v0 = vmov 0.0|0.0   ;;  %vm587_vm0 = vmmov 0   ;;  %v588_v1 = vmov 0.0   ;;  %v201_v2 = vld [vmem:[#allocation8] sm:$0xff] }
  0x4a   :  { %440 = vmatprep.subr.bf16.mxu1 %v586_v0  ;;  %434 = vmatprep.subr.bf16.mxu0 %v586_v0  ;;  %v202_v3 = vld [vmem:[#allocation8 + $0x8] sm:$0xff]  ;;  %v203_v4 = vld [vmem:[#allocation8 + $0x10] sm:$0xff]  ;;  %v204_v6 = vld [vmem:[#allocation8 + $0x18] sm:$0xff]  ;;  %vm82_vm1 = vcmask 261120   ;;  %vm287_vm2 = vcmask 523264   ;;  %vm151_vm3 = vcmask 1041409  }
  0x4b   :  { %431 = vmatprep.mubr.msk.f32.mxu1 %vm587_vm0, %v588_v1  ;;  %412 = vmatprep.mubr.msk.f32.mxu0 %vm587_vm0, %v588_v1  ;;  %v441_v5 = vpack.c.bf16 %v202_v3, %v201_v2  ;;  %v205_v7 = vld [vmem:[#allocation8 + $0x20] sm:$0xff]  ;;  %v206_v8 = vld [vmem:[#allocation8 + $0x28] sm:$0xff]  ;;  %v679_v11 = vld [vmem:[#allocation8 + $0x30] sm:$0xff]  ;;  %v444_v12 = vpack.c.bf16 %v204_v6, %v203_v4  ;;  %vm153_vm4 = vcmask 1042434   ;;  %vm155_vm5 = vcmask 1043459   ;;  %s589_s29 = smov [#allocation11]  }
  0x4c   :  { %v210_v9 = vld [vmem:[#allocation9] sm:$0xff]  ;;  %v211_v10 = vld [vmem:[#allocation9 + $0x8] sm:$0xff]  ;;  %v681_v14 = vld [vmem:[#allocation8 + $0x38] sm:$0xff]  ;;  %v447_v19 = vpack.c.bf16 %v206_v8, %v205_v7  ;;  %vm157_vm6 = vcmask 1044484   ;;  %vm159_vm7 = vcmask 1045509   ;;  %vm161_vm8 = vcmask 1046534  }
  0x4d   :  { %442 = vmatpush3.bf16.msra.mxu1 %v441_v5  ;;  %v435_v13 = vpack.c.bf16 %v211_v10, %v210_v9  ;;  %v212_v15 = vld [vmem:[#allocation9 + $0x10] sm:$0xff]  ;;  %v213_v16 = vld [vmem:[#allocation9 + $0x18] sm:$0xff]  ;;  %v74_v17 = vld [vmem:[#allocation6] sm:$0xff]  ;;  %v450_v26 = vpack.c.bf16 %v681_v14, %v679_v11  ;;  %vm163_vm9 = vcmask 1047559   ;;  %s376_s17 = sshll.u32 %s589_s29, 4  ;;  %s377_s17 = int_to_ptr.vmem [resolvable:$true] %s376_s17 }
  0x4e   :  { %443 = vmatprep.subr.bf16.mxu1 %v586_v0  ;;  %v75_v18 = vld [vmem:[#allocation6 + $0x8] sm:$0xff]  ;;  %v438_v20 = vpack.c.bf16 %v213_v16, %v212_v15  ;;  %v76_v21 = vld [vmem:[#allocation6 + $0x10] sm:$0xff]  ;;  %v77_v22 = vld [vmem:[#allocation6 + $0x18] sm:$0xff]  ;;  %v83_v24 = vsel %vm82_vm1, %v74_v17, 0.0  ;;  %s550_s1 = scalar_lea.vmem %s377_s17, 128  ;;  %p555_p5 = scmp.lt.s32.totalorder %s377_s17, %s377_s17 }
  0x4f   :  { %436 = vmatpush3.bf16.msra.mxu0 %v435_v13  ;;  %v78_v23 = vld [vmem:[#allocation6 + $0x20] sm:$0xff]  ;;  %v90_v25 = vsel %vm82_vm1, %v75_v18, 0.0  ;;  %v79_v27 = vld [vmem:[#allocation6 + $0x28] sm:$0xff]  ;;  %v80_v28 = vld [vmem:[#allocation6 + $0x30] sm:$0xff]  ;;  %v84_v30 = vrot.slane %v83_v24, 4  ;;  %v97_v32 = vsel %vm82_vm1, %v76_v21, 0.0  ;;  %p551_p4 = scmp.ne.s32.totalorder %s377_s17, %s550_s1  ;;  %p556_p6 = scmp.lt.s32.totalorder %s550_s1, %s550_s1 }
  0x50   :  { %437 = vmatprep.subr.bf16.mxu0 %v586_v0  ;;  %v81_v29 = vld [vmem:[#allocation6 + $0x38] sm:$0xff]  ;;  %v91_v31 = vrot.slane %v90_v25, 4  ;;  %v98_v33 = vrot.slane %v97_v32, 4  ;;  %v104_v34 = vsel %vm82_vm1, %v77_v22, 0.0  ;;  %v111_v35 = vsel %vm82_vm1, %v78_v23, 0.0 }
  0x51   :  { %445 = vmatpush3.bf16.msra.mxu1 %v444_v12  ;;  %v118_v36 = vsel %vm82_vm1, %v79_v27, 0.0  ;;  %v85_v37 = vadd.f32 %v84_v30, %v83_v24  ;;  %v105_v39 = vrot.slane %v104_v34, 4  ;;  %v112_v40 = vrot.slane %v111_v35, 4  ;;  %v200_v2 = vld [vmem:[#allocation3] sm:$0xff]  ;;  %p557_p7 = por %p556_p6, %p555_p5 }
  0x52   :  { %446 = vmatprep.subr.bf16.mxu1 %v586_v0  ;;  %v92_v38 = vadd.f32 %v91_v31, %v90_v25  ;;  %v99_v41 = vadd.f32 %v98_v33, %v97_v32  ;;  %v119_v42 = vrot.slane %v118_v36, 4  ;;  %v125_v43 = vsel %vm82_vm1, %v80_v28, 0.0  ;;  %v389_v32 = vld [vmem:[%s723_s4] ss:$0 sm:$0xff] }
  0x53   :  { %439 = vmatpush3.bf16.msra.mxu0 %v438_v20  ;;  %v132_v44 = vsel %vm82_vm1, %v81_v29, 0.0  ;;  %v86_v45 = vrot.slane %v85_v37, 2  ;;  %v106_v47 = vadd.f32 %v105_v39, %v104_v34  ;;  %v113_v48 = vadd.f32 %v112_v40, %v111_v35  ;;  %p558_p8 = pnand %p557_p7, %p551_p4 }
  0x54   :  { %v93_v46 = vrot.slane %v92_v38, 2  ;;  %v100_v49 = vrot.slane %v99_v41, 2  ;;  %v120_v50 = vadd.f32 %v119_v42, %v118_v36  ;;  %v126_v51 = vrot.slane %v125_v43, 4 }
  0x55   :  { %448 = vmatpush3.bf16.msra.mxu1 %v447_v19  ;;  %v133_v52 = vrot.slane %v132_v44, 4  ;;  %v87_v53 = vadd.f32 %v86_v45, %v85_v37  ;;  %v107_v55 = vrot.slane %v106_v47, 2  ;;  %v114_v56 = vrot.slane %v113_v48, 2 }
  0x56   :  { %449 = vmatprep.subr.bf16.mxu1 %v586_v0  ;;  %v94_v54 = vadd.f32 %v93_v46, %v92_v38  ;;  %v101_v57 = vadd.f32 %v100_v49, %v99_v41  ;;  %v121_v58 = vrot.slane %v120_v50, 2  ;;  %v127_v59 = vadd.f32 %v126_v51, %v125_v43 }
  0x57   :  { %v134_v60 = vadd.f32 %v133_v52, %v132_v44  ;;  %v88_v61 = vrot.slane %v87_v53, 1  ;;  %v108_v63 = vadd.f32 %v107_v55, %v106_v47  ;;  %v115_v1 = vadd.f32 %v114_v56, %v113_v48 }
  0x58   :  { %v95_v62 = vrot.slane %v94_v54, 1  ;;  %v102_v3 = vrot.slane %v101_v57, 1  ;;  %v122_v4 = vadd.f32 %v121_v58, %v120_v50  ;;  %v128_v5 = vrot.slane %v127_v59, 2 }
  0x59   :  { %451 = vmatpush3.bf16.msra.mxu1 %v450_v26  ;;  %v135_v6 = vrot.slane %v134_v60, 2  ;;  %v89_v7 = vadd.f32 %v88_v61, %v87_v53  ;;  %v109_v8 = vrot.slane %v108_v63, 1  ;;  %v116_v9 = vrot.slane %v115_v1, 1 }
  0x5a   :  { %v96_v0 = vadd.f32 %v95_v62, %v94_v54  ;;  %v103_v10 = vadd.f32 %v102_v3, %v101_v57  ;;  %v123_v11 = vrot.slane %v122_v4, 1  ;;  %v129_v12 = vadd.f32 %v128_v5, %v127_v59 }
  0x5b   :  { %v136_v13 = vadd.f32 %v135_v6, %v134_v60  ;;  %v110_v14 = vadd.f32 %v109_v8, %v108_v63  ;;  %v117_v15 = vadd.f32 %v116_v9, %v115_v1 }
  0x5c   :  { %432 = vmatmul.mubr.msk.f32.vlgmr.msra.gmra.mrb[0].mxu1 %vm287_vm2, %v200_v2  ;;  %v152_v16 = vsel %vm151_vm3, %v96_v0, %v89_v7  ;;  %v124_v17 = vadd.f32 %v123_v11, %v122_v4  ;;  %v130_v18 = vrot.slane %v129_v12, 1 }
  0x5d   :  { %v137_v19 = vrot.slane %v136_v13, 1  ;;  %v154_v20 = vsel %vm153_vm4, %v103_v10, %v152_v16 }
  0x5e   :  { %v156_v21 = vsel %vm155_vm5, %v110_v14, %v154_v20  ;;  %v131_v22 = vadd.f32 %v130_v18, %v129_v12 }
  0x5f   :  { %v138_v23 = vadd.f32 %v137_v19, %v136_v13  ;;  %v158_v24 = vsel %vm157_vm6, %v117_v15, %v156_v21 }
  0x60   :  { %v160_v25 = vsel %vm159_vm7, %v124_v17, %v158_v24 }
  0x61   :  { %v162_v26 = vsel %vm161_vm8, %v131_v22, %v160_v25 }
  0x62   :  { %v164_v27 = vsel %vm163_vm9, %v138_v23, %v162_v26 }
  0x63   :  { %166 = vst.msk [vmem:[#allocation2] sm:$0xff] %vm82_vm1, %v164_v27 }
  0x6a   :  { %v209_v28 = vld [vmem:[#allocation2] sm:$0xff] }
  0x6b   :  { %413 = vmatmul.mubr.msk.f32.vlgmr.msra.gmra.mrb[0].mxu0 %vm82_vm1, %v209_v28 }
 0x12f   :  { %v357_v29 = vpop.f32.mrb[0].mxu1 }
 0x130   :  { %v433_v30 = vpop.f32.mrb[1].mxu1 }
 0x13e   :  { %v283_v31 = vpop.f32.mrb[0].mxu0 }
 0x13f   :  { %v358_v33 = vadd.f32 %v357_v29, %v283_v31  ;;  %v414_v34 = vpop.f32.mrb[1].mxu0 }
 0x141   :  { %v368_v35 = vadd.f32 %v389_v32, %v358_v33 }
 0x143   :  { %369 = vst [vmem:[#allocation11] sm:$0xff] %v368_v35 }
 0x144   :  { %561 = shalt.err (!%p558_p8)
}
 0x145   :  { %s562_s20 = scalar_lea.hbm %s724_s5, 128 }
 0x146   :  { %p563_p9 = scmp.ne.s32.totalorder %s724_s5, %s562_s20  ;;  %p566_p10 = scmp.lt.u32.totalorder %s562_s20, %s724_s5 }
 0x148   :  { %p568_p11 = pnand %p566_p10, %p563_p9 }
 0x14a   :  { %571 = shalt.err (!%p568_p11)
}
 0x14b   :  { %379 = dma.vmem_to_hbm [thread:$0]  %s377_s17, 128, %s724_s5, [#allocation5]  }
 0x14c   :  { %578 = dma.done.wait [#allocation5], 128  }
 0x14d   :  { %579 = vsyncadd [#allocation5], 4294967168 }
 0x14e   :  { %383 = vsyncpa [#allocation4], 1 }
 0x14f   :  { %384 = vsyncpa [#allocation7], 1 }
 0x150   :  { %385 = vsyncpa [#allocation10], 1 }
 0x151   :  { %386 = vsyncpa [#allocation5], 1 }

// kernel: tpu_custom_call.1
= control target key start
LH: loop header
LB: loop body
LE: loop exit
PB: predicated region body
PF: predicated region fallthrough
CT: control target
= control target key end

     0   :  { %10 = vsyncpa [#allocation4], 0  ;;  %s719_s0 = inlined_call_operand.hbm [shape: f32[8,64], index: 0, kind: input, shape index: {}]   ;;  %s720_s1 = inlined_call_operand.hbm [shape: f32[8,8,32], index: 1, kind: input, shape index: {}]   ;;  %s721_s2 = inlined_call_operand.hbm [shape: f32[64,128], index: 2, kind: input, shape index: {}]   ;;  %s722_s3 = inlined_call_operand.hbm [shape: f32[32,128], index: 3, kind: input, shape index: {}]   ;;  %s723_s4 = inlined_call_operand.vmem [shape: f32[1,128], index: 4, kind: input, shape index: {}]   ;;  %s724_s5 = inlined_call_operand.hbm [shape: f32[8,128], index: 5, kind: output, shape index: {}]  }
   0x1   :  { %11 = vsyncpa [#allocation7], 0 }
   0x2   :  { %12 = vsyncpa [#allocation10], 0 }
   0x3   :  { %13 = vsyncpa [#allocation5], 0  ;;  %s580_s18 = smov [#allocation6]   ;;  %s462_s22 = scalar_lea.hbm %s720_s1, 1024 }
   0x4   :  { %s29_s19 = sshll.u32 %s580_s18, 4  ;;  %p463_p0 = scmp.ne.s32.totalorder %s720_s1, %s462_s22  ;;  %s30_s19 = int_to_ptr.vmem [resolvable:$true] %s29_s19 }
   0x5   :  { %p466_p1 = scmp.lt.u32.totalorder %s462_s22, %s720_s1 }
   0x7   :  { %p468_p2 = pnand %p466_p1, %p463_p0 }
   0x9   :  { %471 = shalt.err (!%p468_p2)
}
   0xa   :  { %s472_s27 = scalar_lea.vmem %s30_s19, 1024  ;;  %p477_p4 = scmp.lt.s32.totalorder %s30_s19, %s30_s19 }
   0xb   :  { %p473_p3 = scmp.ne.s32.totalorder %s30_s19, %s472_s27  ;;  %p478_p5 = scmp.lt.s32.totalorder %s472_s27, %s472_s27 }
   0xd   :  { %p479_p6 = por %p478_p5, %p477_p4 }
   0xf   :  { %p480_p7 = pnand %p479_p6, %p473_p3 }
  0x11   :  { %483 = shalt.err (!%p480_p7)
}
  0x12   :  { %s581_s28 = smov 128   ;;  %s582_s29 = smov 8  }
  0x13   :  { %35 = dma.hbm_to_vmem [thread:$0]  %s720_s1, 1024, %s30_s19, [#allocation7], %s581_s28, %s581_s28, %s582_s29  }
  0x14   :  { %s583_s7 = smov [#allocation3]   ;;  %s584_s9 = smov [#allocation8]  }
  0x15   :  { %s20_s8 = sshll.u32 %s583_s7, 4  ;;  %s41_s10 = sshll.u32 %s584_s9, 4  ;;  %s21_s8 = int_to_ptr.vmem [resolvable:$true] %s20_s8  ;;  %s42_s10 = int_to_ptr.vmem [resolvable:$true] %s41_s10 }
  0x16   :  { %s484_s13 = scalar_lea.hbm %s719_s0, 128 }
  0x17   :  { %p485_p8 = scmp.ne.s32.totalorder %s719_s0, %s484_s13  ;;  %p488_p9 = scmp.lt.u32.totalorder %s484_s13, %s719_s0 }
  0x19   :  { %p490_p10 = pnand %p488_p9, %p485_p8 }
  0x1b   :  { %493 = shalt.err (!%p490_p10)
}
  0x1c   :  { %s494_s1 = scalar_lea.vmem %s21_s8, 128  ;;  %p499_p12 = scmp.lt.s32.totalorder %s21_s8, %s21_s8 }
  0x1d   :  { %p495_p11 = scmp.ne.s32.totalorder %s21_s8, %s494_s1  ;;  %p500_p13 = scmp.lt.s32.totalorder %s494_s1, %s494_s1 }
  0x1f   :  { %p501_p0 = por %p500_p13, %p499_p12 }
  0x21   :  { %p502_p1 = pnand %p501_p0, %p495_p11 }
  0x23   :  { %505 = shalt.err (!%p502_p1)
}
  0x24   :  { %23 = dma.hbm_to_vmem [thread:$0]  %s719_s0, 128, %s21_s8, [#allocation4]  }
  0x25   :  { %s506_s22 = scalar_lea.hbm %s721_s2, 1024 }
  0x26   :  { %p507_p2 = scmp.ne.s32.totalorder %s721_s2, %s506_s22  ;;  %p510_p3 = scmp.lt.u32.totalorder %s506_s22, %s721_s2 }
  0x28   :  { %p512_p4 = pnand %p510_p3, %p507_p2 }
  0x2a   :  { %515 = shalt.err (!%p512_p4)
}
  0x2b   :  { %s516_s27 = scalar_lea.vmem %s42_s10, 1024  ;;  %p521_p6 = scmp.lt.s32.totalorder %s42_s10, %s42_s10 }
  0x2c   :  { %p517_p5 = scmp.ne.s32.totalorder %s42_s10, %s516_s27  ;;  %p522_p7 = scmp.lt.s32.totalorder %s516_s27, %s516_s27 }
  0x2e   :  { %p523_p8 = por %p522_p7, %p521_p6 }
  0x30   :  { %p524_p9 = pnand %p523_p8, %p517_p5 }
  0x32   :  { %527 = shalt.err (!%p524_p9)
}
  0x33   :  { %47 = dma.hbm_to_vmem [thread:$0]  %s721_s2, 1024, %s42_s10, [#allocation7], %s581_s28, %s581_s28, %s582_s29  }
  0x34   :  { %s585_s6 = smov [#allocation9]   ;;  %s528_s11 = scalar_lea.hbm %s722_s3, 512 }
  0x35   :  { %s53_s7 = sshll.u32 %s585_s6, 4  ;;  %p529_p10 = scmp.ne.s32.totalorder %s722_s3, %s528_s11  ;;  %s54_s7 = int_to_ptr.vmem [resolvable:$true] %s53_s7 }
  0x36   :  { %p532_p11 = scmp.lt.u32.totalorder %s528_s11, %s722_s3 }
  0x38   :  { %p534_p12 = pnand %p532_p11, %p529_p10 }
  0x3a   :  { %537 = shalt.err (!%p534_p12)
}
  0x3b   :  { %s538_s16 = scalar_lea.vmem %s54_s7, 512  ;;  %p543_p0 = scmp.lt.s32.totalorder %s54_s7, %s54_s7 }
  0x3c   :  { %p539_p13 = scmp.ne.s32.totalorder %s54_s7, %s538_s16  ;;  %p544_p1 = scmp.lt.s32.totalorder %s538_s16, %s538_s16 }
  0x3e   :  { %p545_p2 = por %p544_p1, %p543_p0 }
  0x40   :  { %p546_p3 = pnand %p545_p2, %p539_p13 }
  0x42   :  { %549 = shalt.err (!%p546_p3)
}
  0x43   :  { %59 = dma.hbm_to_vmem [thread:$0]  %s722_s3, 512, %s54_s7, [#allocation10], %s581_s28, %s581_s28, %s582_s29  }
  0x44   :  { %572 = dma.done.wait [#allocation4], 128  }
  0x45   :  { %573 = vsyncadd [#allocation4], 4294967168 }
  0x46   :  { %574 = dma.done.wait [#allocation7], 2048  }
  0x47   :  { %575 = vsyncadd [#allocation7], 4294965248 }
  0x48   :  { %576 = dma.done.wait [#allocation10], 512  }
  0x49   :  { %577 = vsyncadd [#allocation10], 4294966784  ;;  %v586_v0 = vmov 0.0|0.0   ;;  %vm587_vm0 = vmmov 0   ;;  %v588_v1 = vmov 0.0   ;;  %v201_v2 = vld [vmem:[#allocation8] sm:$0xff] }
  0x4a   :  { %440 = vmatprep.subr.bf16.mxu1 %v586_v0  ;;  %434 = vmatprep.subr.bf16.mxu0 %v586_v0  ;;  %v202_v3 = vld [vmem:[#allocation8 + $0x8] sm:$0xff]  ;;  %v203_v4 = vld [vmem:[#allocation8 + $0x10] sm:$0xff]  ;;  %v204_v6 = vld [vmem:[#allocation8 + $0x18] sm:$0xff]  ;;  %vm82_vm1 = vcmask 261120   ;;  %vm287_vm2 = vcmask 523264   ;;  %vm151_vm3 = vcmask 1041409  }
  0x4b   :  { %431 = vmatprep.mubr.msk.f32.mxu1 %vm587_vm0, %v588_v1  ;;  %412 = vmatprep.mubr.msk.f32.mxu0 %vm587_vm0, %v588_v1  ;;  %v441_v5 = vpack.c.bf16 %v202_v3, %v201_v2  ;;  %v205_v7 = vld [vmem:[#allocation8 + $0x20] sm:$0xff]  ;;  %v206_v8 = vld [vmem:[#allocation8 + $0x28] sm:$0xff]  ;;  %v679_v11 = vld [vmem:[#allocation8 + $0x30] sm:$0xff]  ;;  %v444_v12 = vpack.c.bf16 %v204_v6, %v203_v4  ;;  %vm153_vm4 = vcmask 1042434   ;;  %vm155_vm5 = vcmask 1043459   ;;  %s589_s29 = smov [#allocation11]  }
  0x4c   :  { %v210_v9 = vld [vmem:[#allocation9] sm:$0xff]  ;;  %v211_v10 = vld [vmem:[#allocation9 + $0x8] sm:$0xff]  ;;  %v681_v14 = vld [vmem:[#allocation8 + $0x38] sm:$0xff]  ;;  %v447_v19 = vpack.c.bf16 %v206_v8, %v205_v7  ;;  %vm157_vm6 = vcmask 1044484   ;;  %vm159_vm7 = vcmask 1045509   ;;  %vm161_vm8 = vcmask 1046534  }
  0x4d   :  { %442 = vmatpush3.bf16.msra.mxu1 %v441_v5  ;;  %v435_v13 = vpack.c.bf16 %v211_v10, %v210_v9  ;;  %v212_v15 = vld [vmem:[#allocation9 + $0x10] sm:$0xff]  ;;  %v213_v16 = vld [vmem:[#allocation9 + $0x18] sm:$0xff]  ;;  %v74_v17 = vld [vmem:[#allocation6] sm:$0xff]  ;;  %v450_v26 = vpack.c.bf16 %v681_v14, %v679_v11  ;;  %vm163_vm9 = vcmask 1047559   ;;  %s376_s17 = sshll.u32 %s589_s29, 4  ;;  %s377_s17 = int_to_ptr.vmem [resolvable:$true] %s376_s17 }
  0x4e   :  { %443 = vmatprep.subr.bf16.mxu1 %v586_v0  ;;  %v75_v18 = vld [vmem:[#allocation6 + $0x8] sm:$0xff]  ;;  %v438_v20 = vpack.c.bf16 %v213_v16, %v212_v15  ;;  %v76_v21 = vld [vmem:[#allocation6 + $0x10] sm:$0xff]  ;;  %v77_v22 = vld [vmem:[#allocation6 + $0x18] sm:$0xff]  ;;  %v83_v24 = vsel %vm82_vm1, %v74_v17, 0.0  ;;  %s550_s1 = scalar_lea.vmem %s377_s17, 128  ;;  %p555_p5 = scmp.lt.s32.totalorder %s377_s17, %s377_s17 }
  0x4f   :  { %436 = vmatpush3.bf16.msra.mxu0 %v435_v13  ;;  %v78_v23 = vld [vmem:[#allocation6 + $0x20] sm:$0xff]  ;;  %v90_v25 = vsel %vm82_vm1, %v75_v18, 0.0  ;;  %v79_v27 = vld [vmem:[#allocation6 + $0x28] sm:$0xff]  ;;  %v80_v28 = vld [vmem:[#allocation6 + $0x30] sm:$0xff]  ;;  %v84_v30 = vrot.slane %v83_v24, 4  ;;  %v97_v32 = vsel %vm82_vm1, %v76_v21, 0.0  ;;  %p551_p4 = scmp.ne.s32.totalorder %s377_s17, %s550_s1  ;;  %p556_p6 = scmp.lt.s32.totalorder %s550_s1, %s550_s1 }
  0x50   :  { %437 = vmatprep.subr.bf16.mxu0 %v586_v0  ;;  %v81_v29 = vld [vmem:[#allocation6 + $0x38] sm:$0xff]  ;;  %v91_v31 = vrot.slane %v90_v25, 4  ;;  %v98_v33 = vrot.slane %v97_v32, 4  ;;  %v104_v34 = vsel %vm82_vm1, %v77_v22, 0.0  ;;  %v111_v35 = vsel %vm82_vm1, %v78_v23, 0.0 }
  0x51   :  { %445 = vmatpush3.bf16.msra.mxu1 %v444_v12  ;;  %v118_v36 = vsel %vm82_vm1, %v79_v27, 0.0  ;;  %v85_v37 = vadd.f32 %v84_v30, %v83_v24  ;;  %v105_v39 = vrot.slane %v104_v34, 4  ;;  %v112_v40 = vrot.slane %v111_v35, 4  ;;  %v200_v2 = vld [vmem:[#allocation3] sm:$0xff]  ;;  %p557_p7 = por %p556_p6, %p555_p5 }
  0x52   :  { %446 = vmatprep.subr.bf16.mxu1 %v586_v0  ;;  %v92_v38 = vadd.f32 %v91_v31, %v90_v25  ;;  %v99_v41 = vadd.f32 %v98_v33, %v97_v32  ;;  %v119_v42 = vrot.slane %v118_v36, 4  ;;  %v125_v43 = vsel %vm82_vm1, %v80_v28, 0.0  ;;  %v389_v32 = vld [vmem:[%s723_s4] ss:$0 sm:$0xff] }
  0x53   :  { %439 = vmatpush3.bf16.msra.mxu0 %v438_v20  ;;  %v132_v44 = vsel %vm82_vm1, %v81_v29, 0.0  ;;  %v86_v45 = vrot.slane %v85_v37, 2  ;;  %v106_v47 = vadd.f32 %v105_v39, %v104_v34  ;;  %v113_v48 = vadd.f32 %v112_v40, %v111_v35  ;;  %p558_p8 = pnand %p557_p7, %p551_p4 }
  0x54   :  { %v93_v46 = vrot.slane %v92_v38, 2  ;;  %v100_v49 = vrot.slane %v99_v41, 2  ;;  %v120_v50 = vadd.f32 %v119_v42, %v118_v36  ;;  %v126_v51 = vrot.slane %v125_v43, 4 }
  0x55   :  { %448 = vmatpush3.bf16.msra.mxu1 %v447_v19  ;;  %v133_v52 = vrot.slane %v132_v44, 4  ;;  %v87_v53 = vadd.f32 %v86_v45, %v85_v37  ;;  %v107_v55 = vrot.slane %v106_v47, 2  ;;  %v114_v56 = vrot.slane %v113_v48, 2 }
  0x56   :  { %449 = vmatprep.subr.bf16.mxu1 %v586_v0  ;;  %v94_v54 = vadd.f32 %v93_v46, %v92_v38  ;;  %v101_v57 = vadd.f32 %v100_v49, %v99_v41  ;;  %v121_v58 = vrot.slane %v120_v50, 2  ;;  %v127_v59 = vadd.f32 %v126_v51, %v125_v43 }
  0x57   :  { %v134_v60 = vadd.f32 %v133_v52, %v132_v44  ;;  %v88_v61 = vrot.slane %v87_v53, 1  ;;  %v108_v63 = vadd.f32 %v107_v55, %v106_v47  ;;  %v115_v1 = vadd.f32 %v114_v56, %v113_v48 }
  0x58   :  { %v95_v62 = vrot.slane %v94_v54, 1  ;;  %v102_v3 = vrot.slane %v101_v57, 1  ;;  %v122_v4 = vadd.f32 %v121_v58, %v120_v50  ;;  %v128_v5 = vrot.slane %v127_v59, 2 }
  0x59   :  { %451 = vmatpush3.bf16.msra.mxu1 %v450_v26  ;;  %v135_v6 = vrot.slane %v134_v60, 2  ;;  %v89_v7 = vadd.f32 %v88_v61, %v87_v53  ;;  %v109_v8 = vrot.slane %v108_v63, 1  ;;  %v116_v9 = vrot.slane %v115_v1, 1 }
  0x5a   :  { %v96_v0 = vadd.f32 %v95_v62, %v94_v54  ;;  %v103_v10 = vadd.f32 %v102_v3, %v101_v57  ;;  %v123_v11 = vrot.slane %v122_v4, 1  ;;  %v129_v12 = vadd.f32 %v128_v5, %v127_v59 }
  0x5b   :  { %v136_v13 = vadd.f32 %v135_v6, %v134_v60  ;;  %v110_v14 = vadd.f32 %v109_v8, %v108_v63  ;;  %v117_v15 = vadd.f32 %v116_v9, %v115_v1 }
  0x5c   :  { %432 = vmatmul.mubr.msk.f32.vlgmr.msra.gmra.mrb[0].mxu1 %vm287_vm2, %v200_v2  ;;  %v152_v16 = vsel %vm151_vm3, %v96_v0, %v89_v7  ;;  %v124_v17 = vadd.f32 %v123_v11, %v122_v4  ;;  %v130_v18 = vrot.slane %v129_v12, 1 }
  0x5d   :  { %v137_v19 = vrot.slane %v136_v13, 1  ;;  %v154_v20 = vsel %vm153_vm4, %v103_v10, %v152_v16 }
  0x5e   :  { %v156_v21 = vsel %vm155_vm5, %v110_v14, %v154_v20  ;;  %v131_v22 = vadd.f32 %v130_v18, %v129_v12 }
  0x5f   :  { %v138_v23 = vadd.f32 %v137_v19, %v136_v13  ;;  %v158_v24 = vsel %vm157_vm6, %v117_v15, %v156_v21 }
  0x60   :  { %v160_v25 = vsel %vm159_vm7, %v124_v17, %v158_v24 }
  0x61   :  { %v162_v26 = vsel %vm161_vm8, %v131_v22, %v160_v25 }
  0x62   :  { %v164_v27 = vsel %vm163_vm9, %v138_v23, %v162_v26 }
  0x63   :  { %166 = vst.msk [vmem:[#allocation2] sm:$0xff] %vm82_vm1, %v164_v27 }
  0x6a   :  { %v209_v28 = vld [vmem:[#allocation2] sm:$0xff] }
  0x6b   :  { %413 = vmatmul.mubr.msk.f32.vlgmr.msra.gmra.mrb[0].mxu0 %vm82_vm1, %v209_v28 }
 0x12f   :  { %v357_v29 = vpop.f32.mrb[0].mxu1 }
 0x130   :  { %v433_v30 = vpop.f32.mrb[1].mxu1 }
 0x13e   :  { %v283_v31 = vpop.f32.mrb[0].mxu0 }
 0x13f   :  { %v358_v33 = vadd.f32 %v357_v29, %v283_v31  ;;  %v414_v34 = vpop.f32.mrb[1].mxu0 }
 0x141   :  { %v368_v35 = vadd.f32 %v389_v32, %v358_v33 }
 0x143   :  { %369 = vst [vmem:[#allocation11] sm:$0xff] %v368_v35 }
 0x144   :  { %561 = shalt.err (!%p558_p8)
}
 0x145   :  { %s562_s20 = scalar_lea.hbm %s724_s5, 128 }
 0x146   :  { %p563_p9 = scmp.ne.s32.totalorder %s724_s5, %s562_s20  ;;  %p566_p10 = scmp.lt.u32.totalorder %s562_s20, %s724_s5 }
 0x148   :  { %p568_p11 = pnand %p566_p10, %p563_p9 }
 0x14a   :  { %571 = shalt.err (!%p568_p11)
}
 0x14b   :  { %379 = dma.vmem_to_hbm [thread:$0]  %s377_s17, 128, %s724_s5, [#allocation5]  }
 0x14c   :  { %578 = dma.done.wait [#allocation5], 128  }
 0x14d   :  { %579 = vsyncadd [#allocation5], 4294967168 }
 0x14e   :  { %383 = vsyncpa [#allocation4], 1 }
 0x14f   :  { %384 = vsyncpa [#allocation7], 1 }
 0x150   :  { %385 = vsyncpa [#allocation10], 1 }
 0x151   :  { %386 = vsyncpa [#allocation5], 1 }

</bundles_post_ra>
